<compile_context>
chip_gen: v5e
topology: v5e:2x2
jax: 0.10.0
libtpu: 0.0.40
codegen_flags: <defaults>
</compile_context>

<pallas_src>
import math
import functools

import jax
import jax.numpy as jnp
from jax.experimental import pallas as pl
from jax.experimental.pallas import tpu as pltpu

LANE = 128  # TPU lane width: feature dims padded to a multiple of this


def _round_up(x, m):
    return (x + m - 1) // m * m


def _ffnn_fused_kernel(*refs, num_layers, has_projection):
    """refs = (x_ref, w0, b0, w1, b1, ..., o_ref).

    Runs the whole FFNN on one row-tile: the running activation stays in
    vregs/VMEM for the entire stack (no HBM writeback of intermediates).
    """
    x_ref = refs[0]
    o_ref = refs[-1]
    wb = refs[1:-1]

    h = x_ref[...]  # keep input dtype; cast per-layer to the MXU input dtype
    for i in range(num_layers):
        w = wb[2 * i][...]        # (K_pad, N_pad), pre-transposed, param dtype
        b = wb[2 * i + 1][...]    # (1, N_pad), f32, broadcasts over rows
        acc = jnp.dot(h.astype(w.dtype), w, preferred_element_type=jnp.float32)
        acc = acc + b
        last = i == num_layers - 1
        if (not last) or (not has_projection):
            acc = jnp.maximum(acc, 0.0)
        if not last:
            # Carry inter-layer activations in the param dtype (halves spill
            # bytes when params are bf16); accumulation stays f32 on the MXU.
            h = acc.astype(w.dtype)
        else:
            h = acc
    o_ref[...] = h.astype(o_ref.dtype)


def init_ffnn_params(key, input_size, hidden_size, num_layers, projection_dim=None):
    """Matches the PyTorch module init:
       weight: xavier_uniform with gain=sqrt(2); bias: U(-std, std), std=1/sqrt(hidden)."""
    std = 1.0 / math.sqrt(hidden_size)
    gain = math.sqrt(2.0)

    dims = [(input_size, hidden_size)]
    dims += [(hidden_size, hidden_size)] * (num_layers - 1)
    if projection_dim is not None:
        dims.append((hidden_size, projection_dim))

    params = []
    for fan_in, fan_out in dims:
        key, kw, kb = jax.random.split(key, 3)
        a = gain * math.sqrt(6.0 / (fan_in + fan_out))
        # PyTorch Linear weight shape is (out_features, in_features)
        w = jax.random.uniform(kw, (fan_out, fan_in), jnp.float32, -a, a)
        b = jax.random.uniform(kb, (fan_out,), jnp.float32, -std, std)
        params.append((w, b))
    return params


def prepare_ffnn_params(params, *, param_dtype=jnp.bfloat16):
    """One-time prep: transpose weights to (in, out) and zero-pad feature dims
    to multiples of 128 lanes.

    Zero padding is correctness-preserving: padded input lanes are zero, padded
    weight rows/cols are zero, padded bias entries are zero, so padded output
    lanes stay exactly zero through every Linear(+ReLU) layer.

    Default storage is bf16 (MXU-native, halves weight HBM/VMEM bytes);
    accumulation stays f32 inside the kernel. Pass param_dtype=jnp.float32 for
    bit-tight parity with the f32 PyTorch reference.
    """
    ws, bs = [], []
    for w, b in params:
        out_f, in_f = w.shape
        kp = _round_up(in_f, LANE)
        n_p = _round_up(out_f, LANE)
        w_t = jnp.zeros((kp, n_p), param_dtype).at[:in_f, :out_f].set(
            w.T.astype(param_dtype))
        b_p = jnp.zeros((1, n_p), jnp.float32).at[0, :out_f].set(b)  # bias stays f32
        ws.append(w_t)
        bs.append(b_p)
    return ws, bs


def ffnn_forward(x, prepared_params, *, out_dim, has_projection, tm=512):
    """Forward pass of FFNN (eval semantics: dropout = identity) as one fused kernel."""
    # TODO(synk): training-mode dropout (nn.Dropout active) not reproduced; eval/identity assumed.
    ws, bs = prepared_params
    num_layers = len(ws)
    L, d_in = x.shape
    k0 = ws[0].shape[0]          # padded input feature dim
    n_last = ws[-1].shape[1]     # padded output feature dim

    x_itemsize = jnp.dtype(x.dtype).itemsize
    out_itemsize = x_itemsize
    # dtype-dependent sublane multiple for the row axis (8 for f32, 16 for bf16)
    sublane = max(8, 32 // x_itemsize)

    # Row tile: clamp to the (sublane-rounded) row count; ragged last tile is
    # handled by Pallas masked writes, so rows are NOT padded up to tm.
    tm = max(sublane, min(tm, _round_up(L, sublane)))
    tm = _round_up(tm, sublane)
    grid_m = pl.cdiv(L, tm)

    # Pad the input feature dim only if needed (zero lanes keep results exact).
    if d_in != k0:
        x_p = jnp.zeros((L, k0), x.dtype).at[:, :d_in].set(x)
    else:
        x_p = x

    vmem = pltpu.MemorySpace.VMEM
    single = pl.Buffered(1)   # grid-invariant blocks: one resident copy, never re-DMA'd
    in_specs = [pl.BlockSpec((tm, k0), lambda i: (i, 0), memory_space=vmem)]
    args = [x_p]
    for w, b in zip(ws, bs):
        kp, n_p = w.shape
        in_specs.append(pl.BlockSpec((kp, n_p), lambda i: (0, 0),
                                     memory_space=vmem, pipeline_mode=single))
        in_specs.append(pl.BlockSpec((1, n_p), lambda i: (0, 0),
                                     memory_space=vmem, pipeline_mode=single))
        args += [w, b]

    out_specs = pl.BlockSpec((tm, n_last), lambda i: (i, 0), memory_space=vmem)

    # --- VMEM budget (bytes) -------------------------------------------------
    w_bytes = sum(int(w.size) * w.dtype.itemsize for w in ws)        # single-buffered
    b_bytes = sum(int(b.size) * b.dtype.itemsize for b in bs)        # single-buffered
    max_np = max(w.shape[1] for w in ws)
    act_bytes = 2 * tm * max_np * 4                                  # live f32 layer results
    io_bytes = 2 * tm * k0 * x_itemsize + 2 * tm * n_last * out_itemsize  # double-buffered I/O
    needed = w_bytes + b_bytes + act_bytes + io_bytes
    budget_cap = 100 * 1024 * 1024
    if int(needed * 1.25) > budget_cap:
        raise ValueError(
            f"FFNN fused-resident kernel needs ~{needed / 2**20:.1f} MiB VMEM; "
            "use bf16 params, a smaller tm, or a per-layer tiled fallback.")
    vmem_limit = min(budget_cap, max(int(needed * 1.5), 32 * 1024 * 1024))

    flops = sum(2 * L * w.shape[0] * w.shape[1] for w in ws)
    bytes_accessed = (
        int(x_p.size) * x_itemsize + w_bytes + b_bytes + L * n_last * out_itemsize)

    kernel = functools.partial(
        _ffnn_fused_kernel, num_layers=num_layers, has_projection=has_projection
    )

    out_p = pl.pallas_call(
        kernel,
        out_shape=jax.ShapeDtypeStruct((L, n_last), x.dtype),
        grid=(grid_m,),
        in_specs=in_specs,
        out_specs=out_specs,
        compiler_params=pltpu.CompilerParams(
            # Only ask for megacore sharding when there is >1 row tile; with a
            # single tile the split would just duplicate the weight DMA.
            dimension_semantics=("parallel",) if grid_m > 1 else ("arbitrary",),
            vmem_limit_bytes=vmem_limit,
        ),
        cost_estimate=pl.CostEstimate(
            flops=flops, transcendentals=0, bytes_accessed=bytes_accessed
        ),
    )(*args)

    # Slice the lane-padded output slab back to the logical shape (no-op copy
    # is skipped entirely when the projection dim is already lane-aligned).
    if out_dim != n_last:
        return out_p[:, :out_dim]
    return out_p


if __name__ == "__main__":
    # Small, forward-consistent shapes: input is (L, D).
    L = 8
    input_size = 32
    hidden_size = 32
    num_layers = 3
    projection_dim = 16
    dropout_p = 0.1  # unused at inference (identity)

    key = jax.random.PRNGKey(0)
    key, kx = jax.random.split(key)
    x = jax.random.normal(kx, (L, input_size), jnp.float32)

    params = init_ffnn_params(key, input_size, hidden_size, num_layers, projection_dim)

    # Pure-JAX reference (same semantics as the PyTorch module in eval mode).
    ref = x
    n = len(params)
    for i, (w, b) in enumerate(params):
        ref = ref @ w.T + b
        if i < n - 1 or projection_dim is None:
            ref = jnp.maximum(ref, 0.0)

    # 1) Default (bf16 params, f32 accumulation) — relaxed tolerance vs f32 ref.
    prepared_bf16 = prepare_ffnn_params(params)                      # bf16 default
    out_bf16 = ffnn_forward(
        x, prepared_bf16, out_dim=projection_dim, has_projection=True
    )
    out_bf16 = jax.block_until_ready(out_bf16)
    assert out_bf16.shape == (L, projection_dim)
    assert out_bf16.dtype == jnp.float32
    assert jnp.allclose(out_bf16, ref, atol=5e-2, rtol=5e-2)

    # 2) f32 params — tight check against the reference.
    prepared_f32 = prepare_ffnn_params(params, param_dtype=jnp.float32)
    out_f32 = ffnn_forward(
        x, prepared_f32, out_dim=projection_dim, has_projection=True
    )
    out_f32 = jax.block_until_ready(out_f32)
    assert jnp.allclose(out_f32, ref, atol=1e-5, rtol=1e-5)

    print("KERNEL_OK")
</pallas_src>

<mosaic_0001>
module attributes {stable_mosaic.version = 11 : i64} {
  func.func @_ffnn_fused_kernel(%arg0: i32, %arg1: memref<8x128xf32, #tpu.memory_space<vmem>>, %arg2: memref<128x128xbf16, #tpu.memory_space<vmem>>, %arg3: memref<1x128xf32, #tpu.memory_space<vmem>>, %arg4: memref<128x128xbf16, #tpu.memory_space<vmem>>, %arg5: memref<1x128xf32, #tpu.memory_space<vmem>>, %arg6: memref<128x128xbf16, #tpu.memory_space<vmem>>, %arg7: memref<1x128xf32, #tpu.memory_space<vmem>>, %arg8: memref<128x128xbf16, #tpu.memory_space<vmem>>, %arg9: memref<1x128xf32, #tpu.memory_space<vmem>>, %arg10: memref<8x128xf32, #tpu.memory_space<vmem>>) attributes {dimension_semantics = [#tpu.dimension_semantics<arbitrary>], iteration_bounds = array<i64: 1>, scalar_prefetch = 0 : i64, scratch_operands = 0 : i64, tpu.core_type = #tpu.core_type<tc>, window_params = [{transform_indices = @transform_0, window_bounds = array<i64: 8, 128>}, {pipeline_mode = #tpu.pipeline_mode<synchronous>, transform_indices = @transform_1, window_bounds = array<i64: 128, 128>}, {pipeline_mode = #tpu.pipeline_mode<synchronous>, transform_indices = @transform_2, window_bounds = array<i64: 1, 128>}, {pipeline_mode = #tpu.pipeline_mode<synchronous>, transform_indices = @transform_3, window_bounds = array<i64: 128, 128>}, {pipeline_mode = #tpu.pipeline_mode<synchronous>, transform_indices = @transform_4, window_bounds = array<i64: 1, 128>}, {pipeline_mode = #tpu.pipeline_mode<synchronous>, transform_indices = @transform_5, window_bounds = array<i64: 128, 128>}, {pipeline_mode = #tpu.pipeline_mode<synchronous>, transform_indices = @transform_6, window_bounds = array<i64: 1, 128>}, {pipeline_mode = #tpu.pipeline_mode<synchronous>, transform_indices = @transform_7, window_bounds = array<i64: 128, 128>}, {pipeline_mode = #tpu.pipeline_mode<synchronous>, transform_indices = @transform_8, window_bounds = array<i64: 1, 128>}, {transform_indices = @transform_9, window_bounds = array<i64: 8, 128>}]} {
    %c0 = arith.constant 0 : index
    %c0_0 = arith.constant 0 : index
    %0 = vector.load %arg1[%c0, %c0_0] : memref<8x128xf32, #tpu.memory_space<vmem>>, vector<8x128xf32>
    %c0_1 = arith.constant 0 : index
    %c0_2 = arith.constant 0 : index
    %1 = vector.load %arg2[%c0_1, %c0_2] : memref<128x128xbf16, #tpu.memory_space<vmem>>, vector<128x128xbf16>
    %c0_3 = arith.constant 0 : index
    %c0_4 = arith.constant 0 : index
    %2 = vector.load %arg3[%c0_3, %c0_4] : memref<1x128xf32, #tpu.memory_space<vmem>>, vector<1x128xf32>
    %3 = arith.truncf %0 : vector<8x128xf32> to vector<8x128xbf16>
    %cst = arith.constant dense<0.000000e+00> : vector<8x128xf32>
    %4 = tpu.matmul %3, %1, %cst {dimension_numbers = #tpu.dot_dimension_numbers<[1], [0], [0], [1], [0, 0, 1, 1], [], []>} : vector<8x128xbf16>, vector<128x128xbf16>, vector<8x128xf32> -> vector<8x128xf32>
    %5 = vector.broadcast %2 : vector<1x128xf32> to vector<8x128xf32>
    %6 = arith.addf %4, %5 : vector<8x128xf32>
    %cst_5 = arith.constant 0.000000e+00 : f32
    %7 = vector.broadcast %cst_5 : f32 to vector<8x128xf32>
    %8 = arith.maximumf %6, %7 : vector<8x128xf32>
    %9 = arith.truncf %8 : vector<8x128xf32> to vector<8x128xbf16>
    %c0_6 = arith.constant 0 : index
    %c0_7 = arith.constant 0 : index
    %10 = vector.load %arg4[%c0_6, %c0_7] : memref<128x128xbf16, #tpu.memory_space<vmem>>, vector<128x128xbf16>
    %c0_8 = arith.constant 0 : index
    %c0_9 = arith.constant 0 : index
    %11 = vector.load %arg5[%c0_8, %c0_9] : memref<1x128xf32, #tpu.memory_space<vmem>>, vector<1x128xf32>
    %cst_10 = arith.constant dense<0.000000e+00> : vector<8x128xf32>
    %12 = tpu.matmul %9, %10, %cst_10 {dimension_numbers = #tpu.dot_dimension_numbers<[1], [0], [0], [1], [0, 0, 1, 1], [], []>} : vector<8x128xbf16>, vector<128x128xbf16>, vector<8x128xf32> -> vector<8x128xf32>
    %13 = vector.broadcast %11 : vector<1x128xf32> to vector<8x128xf32>
    %14 = arith.addf %12, %13 : vector<8x128xf32>
    %cst_11 = arith.constant 0.000000e+00 : f32
    %15 = vector.broadcast %cst_11 : f32 to vector<8x128xf32>
    %16 = arith.maximumf %14, %15 : vector<8x128xf32>
    %17 = arith.truncf %16 : vector<8x128xf32> to vector<8x128xbf16>
    %c0_12 = arith.constant 0 : index
    %c0_13 = arith.constant 0 : index
    %18 = vector.load %arg6[%c0_12, %c0_13] : memref<128x128xbf16, #tpu.memory_space<vmem>>, vector<128x128xbf16>
    %c0_14 = arith.constant 0 : index
    %c0_15 = arith.constant 0 : index
    %19 = vector.load %arg7[%c0_14, %c0_15] : memref<1x128xf32, #tpu.memory_space<vmem>>, vector<1x128xf32>
    %cst_16 = arith.constant dense<0.000000e+00> : vector<8x128xf32>
    %20 = tpu.matmul %17, %18, %cst_16 {dimension_numbers = #tpu.dot_dimension_numbers<[1], [0], [0], [1], [0, 0, 1, 1], [], []>} : vector<8x128xbf16>, vector<128x128xbf16>, vector<8x128xf32> -> vector<8x128xf32>
    %21 = vector.broadcast %19 : vector<1x128xf32> to vector<8x128xf32>
    %22 = arith.addf %20, %21 : vector<8x128xf32>
    %cst_17 = arith.constant 0.000000e+00 : f32
    %23 = vector.broadcast %cst_17 : f32 to vector<8x128xf32>
    %24 = arith.maximumf %22, %23 : vector<8x128xf32>
    %25 = arith.truncf %24 : vector<8x128xf32> to vector<8x128xbf16>
    %c0_18 = arith.constant 0 : index
    %c0_19 = arith.constant 0 : index
    %26 = vector.load %arg8[%c0_18, %c0_19] : memref<128x128xbf16, #tpu.memory_space<vmem>>, vector<128x128xbf16>
    %c0_20 = arith.constant 0 : index
    %c0_21 = arith.constant 0 : index
    %27 = vector.load %arg9[%c0_20, %c0_21] : memref<1x128xf32, #tpu.memory_space<vmem>>, vector<1x128xf32>
    %cst_22 = arith.constant dense<0.000000e+00> : vector<8x128xf32>
    %28 = tpu.matmul %25, %26, %cst_22 {dimension_numbers = #tpu.dot_dimension_numbers<[1], [0], [0], [1], [0, 0, 1, 1], [], []>} : vector<8x128xbf16>, vector<128x128xbf16>, vector<8x128xf32> -> vector<8x128xf32>
    %29 = vector.broadcast %27 : vector<1x128xf32> to vector<8x128xf32>
    %30 = arith.addf %28, %29 : vector<8x128xf32>
    %c0_23 = arith.constant 0 : index
    %c0_24 = arith.constant 0 : index
    %31 = vector.load %arg10[%c0_23, %c0_24] : memref<8x128xf32, #tpu.memory_space<vmem>>, vector<8x128xf32>
    tpu.vector_store %arg10[%c0_23, %c0_24], %30 {strides = array<i32>} : memref<8x128xf32, #tpu.memory_space<vmem>>, vector<8x128xf32>,
    return
  }
  func.func @transform_0(%arg0: i32) -> (i32, i32) {
    %c0_i32 = arith.constant 0 : i32
    %c0_i32_0 = arith.constant 0 : i32
    return %arg0, %c0_i32 : i32, i32
  }
  func.func @transform_1(%arg0: i32) -> (i32, i32) {
    %c0_i32 = arith.constant 0 : i32
    %c0_i32_0 = arith.constant 0 : i32
    %c0_i32_1 = arith.constant 0 : i32
    return %c0_i32, %c0_i32_0 : i32, i32
  }
  func.func @transform_2(%arg0: i32) -> (i32, i32) {
    %c0_i32 = arith.constant 0 : i32
    %c0_i32_0 = arith.constant 0 : i32
    %c0_i32_1 = arith.constant 0 : i32
    return %c0_i32, %c0_i32_0 : i32, i32
  }
  func.func @transform_3(%arg0: i32) -> (i32, i32) {
    %c0_i32 = arith.constant 0 : i32
    %c0_i32_0 = arith.constant 0 : i32
    %c0_i32_1 = arith.constant 0 : i32
    return %c0_i32, %c0_i32_0 : i32, i32
  }
  func.func @transform_4(%arg0: i32) -> (i32, i32) {
    %c0_i32 = arith.constant 0 : i32
    %c0_i32_0 = arith.constant 0 : i32
    %c0_i32_1 = arith.constant 0 : i32
    return %c0_i32, %c0_i32_0 : i32, i32
  }
  func.func @transform_5(%arg0: i32) -> (i32, i32) {
    %c0_i32 = arith.constant 0 : i32
    %c0_i32_0 = arith.constant 0 : i32
    %c0_i32_1 = arith.constant 0 : i32
    return %c0_i32, %c0_i32_0 : i32, i32
  }
  func.func @transform_6(%arg0: i32) -> (i32, i32) {
    %c0_i32 = arith.constant 0 : i32
    %c0_i32_0 = arith.constant 0 : i32
    %c0_i32_1 = arith.constant 0 : i32
    return %c0_i32, %c0_i32_0 : i32, i32
  }
  func.func @transform_7(%arg0: i32) -> (i32, i32) {
    %c0_i32 = arith.constant 0 : i32
    %c0_i32_0 = arith.constant 0 : i32
    %c0_i32_1 = arith.constant 0 : i32
    return %c0_i32, %c0_i32_0 : i32, i32
  }
  func.func @transform_8(%arg0: i32) -> (i32, i32) {
    %c0_i32 = arith.constant 0 : i32
    %c0_i32_0 = arith.constant 0 : i32
    %c0_i32_1 = arith.constant 0 : i32
    return %c0_i32, %c0_i32_0 : i32, i32
  }
  func.func @transform_9(%arg0: i32) -> (i32, i32) {
    %c0_i32 = arith.constant 0 : i32
    %c0_i32_0 = arith.constant 0 : i32
    return %arg0, %c0_i32 : i32, i32
  }
}

</mosaic_0001>

<bundles_post_ra>
// kernel: tpu_custom_call.1
= control target key start
LH: loop header
LB: loop body
LE: loop exit
PB: predicated region body
PF: predicated region fallthrough
CT: control target
= control target key end

     0   :  { %14 = vsyncpa [#allocation3], 0  ;;  %s873_s0 = inlined_call_operand.hbm [shape: f32[8,128], index: 0, kind: input, shape index: {}]   ;;  %s874_s1 = inlined_call_operand.hbm [shape: bf16[128,128], index: 1, kind: input, shape index: {}]   ;;  %s875_s2 = inlined_call_operand.vmem [shape: f32[1,128], index: 2, kind: input, shape index: {}]   ;;  %s876_s3 = inlined_call_operand.hbm [shape: bf16[128,128], index: 3, kind: input, shape index: {}]   ;;  %s877_s4 = inlined_call_operand.vmem [shape: f32[1,128], index: 4, kind: input, shape index: {}]   ;;  %s878_s5 = inlined_call_operand.hbm [shape: bf16[128,128], index: 5, kind: input, shape index: {}]   ;;  %s879_s6 = inlined_call_operand.vmem [shape: f32[1,128], index: 6, kind: input, shape index: {}]   ;;  %s880_s7 = inlined_call_operand.hbm [shape: bf16[128,128], index: 7, kind: input, shape index: {}]   ;;  %s881_s8 = inlined_call_operand.vmem [shape: f32[1,128], index: 8, kind: input, shape index: {}]   ;;  %s882_s9 = inlined_call_operand.hbm [shape: f32[8,128], index: 9, kind: output, shape index: {}]  }
   0x1   :  { %15 = vsyncpa [#allocation6], 0 }
   0x2   :  { %16 = vsyncpa [#allocation9], 0  ;;  %s33_s11 = sshll.u32 %s874_s1, 4  ;;  %s34_s11 = int_to_ptr.hbm [resolvable:$true] %s33_s11 }
   0x3   :  { %17 = vsyncpa [#allocation4], 0  ;;  %s785_s12 = smov [#allocation5]   ;;  %s63_s16 = sshll.u32 %s878_s5, 4  ;;  %s64_s16 = int_to_ptr.hbm [resolvable:$true] %s63_s16 }
   0x4   :  { %s35_s13 = sshll.u32 %s785_s12, 4  ;;  %s786_s17 = smov 64   ;;  %s36_s13 = int_to_ptr.vmem [resolvable:$true] %s35_s13 }
   0x5   :  { %s787_s18 = smov 4   ;;  %s788_s19 = smov [#allocation8]  }
   0x6   :  { %41 = dma.hbm_to_vmem [thread:$0]  %s34_s11, 1024, %s36_s13, [#allocation6], %s786_s17, %s786_s17, %s787_s18  }
   0x7   :  { %s65_s20 = sshll.u32 %s788_s19, 4  ;;  %s23_s23 = sshll.u32 %s873_s0, 4  ;;  %s66_s20 = int_to_ptr.vmem [resolvable:$true] %s65_s20  ;;  %s24_s23 = int_to_ptr.hbm [resolvable:$true] %s23_s23 }
   0x8   :  { %71 = dma.hbm_to_vmem [thread:$0]  %s64_s16, 1024, %s66_s20, [#allocation9], %s786_s17, %s786_s17, %s787_s18  }
   0x9   :  { %s48_s25 = sshll.u32 %s876_s3, 4  ;;  %s789_s26 = smov [#allocation2]   ;;  %s49_s25 = int_to_ptr.hbm [resolvable:$true] %s48_s25 }
   0xa   :  { %s25_s27 = sshll.u32 %s789_s26, 4  ;;  %s790_s5 = smov [#allocation7]   ;;  %s26_s27 = int_to_ptr.vmem [resolvable:$true] %s25_s27 }
   0xb   :  { %28 = dma.hbm_to_vmem [thread:$0]  %s24_s23, 128, %s26_s27, [#allocation3]  }
   0xc   :  { %s50_s28 = sshll.u32 %s790_s5, 4  ;;  %s78_s10 = sshll.u32 %s880_s7, 4  ;;  %s51_s28 = int_to_ptr.vmem [resolvable:$true] %s50_s28  ;;  %s79_s10 = int_to_ptr.hbm [resolvable:$true] %s78_s10 }
   0xd   :  { %56 = dma.hbm_to_vmem [thread:$0]  %s49_s25, 1024, %s51_s28, [#allocation6], %s786_s17, %s786_s17, %s787_s18  }
   0xe   :  { %s791_s0 = smov [#allocation10]  }
   0xf   :  { %s80_s11 = sshll.u32 %s791_s0, 4  ;;  %s81_s11 = int_to_ptr.vmem [resolvable:$true] %s80_s11 }
  0x10   :  { %86 = dma.hbm_to_vmem [thread:$0]  %s79_s10, 1024, %s81_s11, [#allocation9], %s786_s17, %s786_s17, %s787_s18  }
  0x11   :  { %777 = dma.done.wait [#allocation3], 128  }
  0x12   :  { %778 = vsyncadd [#allocation3], 4294967168 }
  0x13   :  { %779 = dma.done.wait [#allocation6], 2048  }
  0x14   :  { %780 = vsyncadd [#allocation6], 4294965248 }
  0x15   :  { %781 = dma.done.wait [#allocation9], 2048  }
  0x16   :  { %782 = vsyncadd [#allocation9], 4294965248  ;;  %v596_v0 = vld [vmem:[#allocation5 + $0x38] sm:$0xff]  ;;  %v595_v1 = vld [vmem:[#allocation5 + $0x30] sm:$0xff]  ;;  %s792_s16 = smov [#allocation11]   ;;  %s449_s20 = sshll.u32 %s882_s9, 4  ;;  %s450_s20 = int_to_ptr.hbm [resolvable:$true] %s449_s20 }
  0x17   :  { %179 = vmatpush.bf16.msra.mxu0 %v596_v0  ;;  %v604_v2 = vld [vmem:[#allocation7 + $0x38] sm:$0xff]  ;;  %v603_v3 = vld [vmem:[#allocation7 + $0x30] sm:$0xff]  ;;  %v594_v4 = vld [vmem:[#allocation5 + $0x28] sm:$0xff]  ;;  %s447_s17 = sshll.u32 %s792_s16, 4  ;;  %s448_s17 = int_to_ptr.vmem [resolvable:$true] %s447_s17 }
  0x18   :  { %262 = vmatpush.bf16.msra.mxu1 %v604_v2  ;;  %v602_v5 = vld [vmem:[#allocation7 + $0x28] sm:$0xff]  ;;  %v593_v6 = vld [vmem:[#allocation5 + $0x20] sm:$0xff]  ;;  %v592_v8 = vld [vmem:[#allocation5 + $0x18] sm:$0xff] }
  0x19   :  { %v601_v7 = vld [vmem:[#allocation7 + $0x20] sm:$0xff]  ;;  %v600_v9 = vld [vmem:[#allocation7 + $0x18] sm:$0xff]  ;;  %v591_v10 = vld [vmem:[#allocation5 + $0x10] sm:$0xff] }
  0x1a   :  { %v599_v11 = vld [vmem:[#allocation7 + $0x10] sm:$0xff]  ;;  %v590_v12 = vld [vmem:[#allocation5 + $0x8] sm:$0xff]  ;;  %v589_v13 = vld [vmem:[#allocation5] sm:$0xff] }
  0x1b   :  { %180 = vmatpush.bf16.msra.mxu0 %v595_v1  ;;  %v109_v14 = vld [vmem:[#allocation2] sm:$0xff]  ;;  %v598_v16 = vld [vmem:[#allocation7 + $0x8] sm:$0xff]  ;;  %v597_v17 = vld [vmem:[#allocation7] sm:$0xff] }
  0x1c   :  { %263 = vmatpush.bf16.msra.mxu1 %v603_v3  ;;  %v127_v15 = vpack.c.bf16 %v109_v14, %v109_v14  ;;  %v612_v18 = vld [vmem:[#allocation8 + $0x38] sm:$0xff]  ;;  %v611_v19 = vld [vmem:[#allocation8 + $0x30] sm:$0xff]  ;;  %v610_v20 = vld [vmem:[#allocation8 + $0x28] sm:$0xff] }
  0x1d   :  { %345 = vmatpush.bf16.msra.mxu2 %v612_v18  ;;  %v609_v21 = vld [vmem:[#allocation8 + $0x20] sm:$0xff]  ;;  %v608_v22 = vld [vmem:[#allocation8 + $0x18] sm:$0xff]  ;;  %v607_v23 = vld [vmem:[#allocation8 + $0x10] sm:$0xff] }
  0x1e   :  { %v629_v24 = vld [vmem:[%s875_s2] ss:$0 sm:$0xff]  ;;  %v606_v30 = vld [vmem:[#allocation8 + $0x8] sm:$0xff]  ;;  %v605_v31 = vld [vmem:[#allocation8] sm:$0xff] }
  0x1f   :  { %181 = vmatpush.bf16.msra.mxu0 %v594_v4  ;;  %v620_v32 = vld [vmem:[#allocation10 + $0x38] sm:$0xff]  ;;  %v619_v33 = vld [vmem:[#allocation10 + $0x30] sm:$0xff]  ;;  %v618_v34 = vld [vmem:[#allocation10 + $0x28] sm:$0xff] }
  0x20   :  { %264 = vmatpush.bf16.msra.mxu1 %v602_v5  ;;  %428 = vmatpush.bf16.msra.mxu3 %v620_v32  ;;  %v617_v35 = vld [vmem:[#allocation10 + $0x20] sm:$0xff]  ;;  %v616_v36 = vld [vmem:[#allocation10 + $0x18] sm:$0xff]  ;;  %v615_v37 = vld [vmem:[#allocation10 + $0x10] sm:$0xff] }
  0x21   :  { %346 = vmatpush.bf16.msra.mxu2 %v611_v19  ;;  %v630_v38 = vld [vmem:[%s877_s4] ss:$0 sm:$0xff]  ;;  %v614_v44 = vld [vmem:[#allocation10 + $0x8] sm:$0xff]  ;;  %v613_v45 = vld [vmem:[#allocation10] sm:$0xff] }
  0x22   :  { %v631_v46 = vld [vmem:[%s879_s6] ss:$0 sm:$0xff] }
  0x23   :  { %182 = vmatpush.bf16.msra.mxu0 %v593_v6  ;;  %v632_v52 = vld [vmem:[%s881_s8] ss:$0 sm:$0xff] }
  0x24   :  { %265 = vmatpush.bf16.msra.mxu1 %v601_v7  ;;  %429 = vmatpush.bf16.msra.mxu3 %v619_v33 }
  0x25   :  { %347 = vmatpush.bf16.msra.mxu2 %v610_v20 }
  0x27   :  { %183 = vmatpush.bf16.msra.mxu0 %v592_v8 }
  0x28   :  { %266 = vmatpush.bf16.msra.mxu1 %v600_v9  ;;  %430 = vmatpush.bf16.msra.mxu3 %v618_v34 }
  0x29   :  { %348 = vmatpush.bf16.msra.mxu2 %v609_v21 }
  0x2b   :  { %184 = vmatpush.bf16.msra.mxu0 %v591_v10 }
  0x2c   :  { %267 = vmatpush.bf16.msra.mxu1 %v599_v11  ;;  %431 = vmatpush.bf16.msra.mxu3 %v617_v35 }
  0x2d   :  { %349 = vmatpush.bf16.msra.mxu2 %v608_v22 }
  0x2f   :  { %185 = vmatpush.bf16.msra.mxu0 %v590_v12 }
  0x30   :  { %268 = vmatpush.bf16.msra.mxu1 %v598_v16  ;;  %432 = vmatpush.bf16.msra.mxu3 %v616_v36 }
  0x31   :  { %350 = vmatpush.bf16.msra.mxu2 %v607_v23 }
  0x33   :  { %186 = vmatpush.bf16.msra.mxu0 %v589_v13 }
  0x34   :  { %269 = vmatpush.bf16.msra.mxu1 %v597_v17  ;;  %433 = vmatpush.bf16.msra.mxu3 %v615_v37 }
  0x35   :  { %351 = vmatpush.bf16.msra.mxu2 %v606_v30 }
  0x36   :  { %187 = vmatmul.bf16.vlgmr.msra.gmra.mxu0 %v127_v15 }
  0x38   :  { %434 = vmatpush.bf16.msra.mxu3 %v614_v44 }
  0x39   :  { %352 = vmatpush.bf16.msra.mxu2 %v605_v31 }
  0x3c   :  { %435 = vmatpush.bf16.msra.mxu3 %v613_v45 }
  0xb3   :  { %v188_v25 = vpop.f32.mrf.mxu0 }
  0xb4   :  { %v189_v26 = vadd.f32 %v629_v24, %v188_v25 }
  0xb6   :  { %v192_v27 = vmax.f32 %v189_v26, 0.0 }
  0xb8   :  { %v193_v28 = vpack.c.bf16 %v192_v27, %v192_v27 }
  0xba   :  { %270 = vmatmul.bf16.vlgmr.msra.gmra.mxu1 %v193_v28 }
  0xbb   :  { %v190_v29 = vpop.f32.mrf.mxu0 }
 0x137   :  { %v271_v39 = vpop.f32.mrf.mxu1 }
 0x138   :  { %v272_v40 = vadd.f32 %v630_v38, %v271_v39 }
 0x13a   :  { %v275_v41 = vmax.f32 %v272_v40, 0.0 }
 0x13c   :  { %v276_v42 = vpack.c.bf16 %v275_v41, %v275_v41 }
 0x13e   :  { %353 = vmatmul.bf16.vlgmr.msra.gmra.mxu2 %v276_v42 }
 0x13f   :  { %v273_v43 = vpop.f32.mrf.mxu1 }
 0x1c1   :  { %v354_v47 = vpop.f32.mrf.mxu2 }
 0x1c2   :  { %v355_v48 = vadd.f32 %v631_v46, %v354_v47 }
 0x1c4   :  { %v358_v49 = vmax.f32 %v355_v48, 0.0 }
 0x1c6   :  { %v359_v50 = vpack.c.bf16 %v358_v49, %v358_v49 }
 0x1c8   :  { %436 = vmatmul.bf16.vlgmr.msra.gmra.mxu3 %v359_v50 }
 0x1c9   :  { %v356_v51 = vpop.f32.mrf.mxu2 }
 0x24b   :  { %v437_v53 = vpop.f32.mrf.mxu3 }
 0x24c   :  { %v438_v54 = vadd.f32 %v632_v52, %v437_v53 }
 0x24e   :  { %441 = vst [vmem:[#allocation11] sm:$0xff] %v438_v54 }
 0x24f   :  { %452 = dma.vmem_to_hbm [thread:$0]  %s448_s17, 128, %s450_s20, [#allocation4]  }
 0x253   :  { %v439_v55 = vpop.f32.mrf.mxu3 }
 0x254   :  { %783 = dma.done.wait [#allocation4], 128  }
 0x255   :  { %784 = vsyncadd [#allocation4], 4294967168 }
 0x256   :  { %457 = vsyncpa [#allocation3], 1 }
 0x257   :  { %458 = vsyncpa [#allocation6], 1 }
 0x258   :  { %459 = vsyncpa [#allocation9], 1 }
 0x259   :  { %460 = vsyncpa [#allocation4], 1 }

</bundles_post_ra>
